<compile_context>
chip_gen: v6e
topology: v6e:2x2x1
jax: 0.10.0
libtpu: 0.0.40
codegen_flags: <defaults>
</compile_context>

<pallas_src>
import functools

import jax
import jax.numpy as jnp
from jax import lax
from jax.experimental import pallas as pl
from jax.experimental.pallas import tpu as pltpu


LANES = 128            # lane width (last-dim tile unit)
MAX_BLOCK_ROWS = 8192  # (8192, 128) f32 = 4 MiB per input per grid step
ACC_SUBLANES = 8       # accumulator scratch is a single (8, 128) vreg tile


def _round_up(a, b):
    return ((a + b - 1) // b) * b


def _min_sublane_multiple(*dtypes):
    """Sublane multiple required by the narrowest input dtype (8/16/32)."""
    m = 8
    for dt in dtypes:
        itemsize = jnp.dtype(dt).itemsize
        if itemsize <= 1:
            m = max(m, 32)
        elif itemsize <= 2:
            m = max(m, 16)
    return m


def _tensorcores_per_chip():
    """2 TensorCores per chip only on v7x; v5e/v6e have 1 (safe fallback: 1)."""
    try:
        kind = jax.devices()[0].device_kind.lower()
    except Exception:
        return 1
    return 2 if "v7" in kind else 1


def _masked_mse_sum_kernel(x_ref, t_ref, m_ref, out_ref, acc_ref, *,
                           block_rows, steps_per_slice, total_rows,
                           full_blocks, needs_mask):
    s = pl.program_id(0)   # parallel slice id
    i = pl.program_id(1)   # reduction step within the slice

    @pl.when(i == 0)
    def _init():
        acc_ref[...] = jnp.zeros_like(acc_ref)

    x = x_ref[...].astype(jnp.float32)
    t = t_ref[...].astype(jnp.float32)
    m = m_ref[...].astype(jnp.float32)   # mask may arrive as bool/int8/bf16/f32
    d = x * m - t
    sq = d * d

    groups = block_rows // ACC_SUBLANES

    if needs_mask:
        blk = s * steps_per_slice + i

        # Steady-state blocks: pure sublane-group VPU accumulation, no masking.
        @pl.when(blk < full_blocks)
        def _clean():
            acc_ref[...] += jnp.sum(
                sq.reshape(groups, ACC_SUBLANES, LANES), axis=0)

        # Only the last (partial) real block and phantom blocks are ragged:
        # zero rows past the real array.  The `where` is applied AFTER the
        # square so any Inf/NaN from unspecified VMEM is discarded.
        @pl.when(blk >= full_blocks)
        def _ragged():
            row0 = blk * block_rows
            ridx = row0 + lax.broadcasted_iota(jnp.int32, sq.shape, 0)
            sq_m = jnp.where(ridx < total_rows, sq, 0.0)
            acc_ref[...] += jnp.sum(
                sq_m.reshape(groups, ACC_SUBLANES, LANES), axis=0)
    else:
        acc_ref[...] += jnp.sum(sq.reshape(groups, ACC_SUBLANES, LANES), axis=0)

    @pl.when(i == pl.num_programs(1) - 1)
    def _finalize():
        out_ref[0, 0] = jnp.sum(acc_ref[...])   # single cross-lane reduce


def masked_mse_loss(x, target, mask):
    """Pallas equivalent of MaskedMSELoss()(x, target, mask) ('mean' reduction).

    Pass `mask` (and inputs, where possible) in their narrow native dtype
    (bool/int8 mask, bf16 activations); casting happens in-kernel.
    """
    assert x.shape == target.shape == mask.shape
    n = x.size
    if n == 0:
        return jnp.float32(jnp.nan)

    xf = x.reshape(-1)
    tf = target.reshape(-1)
    mf = mask.reshape(-1)

    # Common case (conv-style shapes): numel % 128 == 0 and the reshape below
    # is a zero-copy view.  Ragged sizes take a small host-side pad.
    # TODO(synk): replace the ragged-path pad with an in-kernel flat-index tail
    # mask to avoid the extra HBM pass for non-128-aligned sizes.
    rem = n % LANES
    if rem:
        pad = LANES - rem
        xf = jnp.pad(xf, (0, pad))
        tf = jnp.pad(tf, (0, pad))
        mf = jnp.pad(mf, (0, pad))
    rows = xf.size // LANES

    x2d = xf.reshape(rows, LANES)
    t2d = tf.reshape(rows, LANES)
    m2d = mf.reshape(rows, LANES)

    sub = _min_sublane_multiple(x2d.dtype, t2d.dtype, m2d.dtype)
    block_rows = min(MAX_BLOCK_ROWS, _round_up(rows, sub))
    n_blocks = pl.cdiv(rows, block_rows)

    # 2 parallel slices only on 2-TensorCore chips (v7x); sequential otherwise.
    num_slices = _tensorcores_per_chip() if n_blocks >= 2 else 1
    steps = pl.cdiv(n_blocks, num_slices)
    covered_blocks = num_slices * steps
    full_blocks = rows // block_rows                 # blocks with no ragged rows
    needs_mask = (covered_blocks * block_rows) != rows

    if covered_blocks > n_blocks:
        # Phantom block (odd block count with 2 slices): map it onto the
        # previous block index so the pipeline skips the redundant DMA; its
        # contribution is masked to zero in-kernel.
        def in_index(si, ii):
            return (jnp.minimum(si * steps + ii, n_blocks - 1), 0)
    else:
        def in_index(si, ii):
            return (si * steps + ii, 0)

    in_spec = pl.BlockSpec((block_rows, LANES), in_index)
    out_spec = pl.BlockSpec((1, 1), lambda si, ii: (si, 0),
                            memory_space=pltpu.SMEM)

    kernel = functools.partial(
        _masked_mse_sum_kernel,
        block_rows=block_rows,
        steps_per_slice=steps,
        total_rows=rows,
        full_blocks=full_blocks,
        needs_mask=needs_mask,
    )

    partials = pl.pallas_call(
        kernel,
        out_shape=jax.ShapeDtypeStruct((num_slices, 1), jnp.float32),
        grid_spec=pltpu.PrefetchScalarGridSpec(
            num_scalar_prefetch=0,
            grid=(num_slices, steps),
            in_specs=[in_spec, in_spec, in_spec],
            out_specs=out_spec,
            scratch_shapes=[pltpu.VMEM((ACC_SUBLANES, LANES), jnp.float32)],
        ),
        compiler_params=pltpu.CompilerParams(
            dimension_semantics=("parallel", "arbitrary"),
            vmem_limit_bytes=32 * 1024 * 1024,
        ),
    )(x2d, t2d, m2d)

    return jnp.sum(partials) / jnp.float32(n)


if __name__ == "__main__":
    key = jax.random.PRNGKey(0)
    kx, kt, km = jax.random.split(key, 3)

    # Small NCHW-shaped inputs, as a conv-style model would produce.
    # Mask stays in its narrow native dtype (bool); the kernel casts in VMEM.
    shape = (2, 4, 16, 16)
    x = jax.random.normal(kx, shape, dtype=jnp.float32)
    target = jax.random.normal(kt, shape, dtype=jnp.float32)
    mask = jax.random.uniform(km, shape) > 0.5          # bool

    loss = masked_mse_loss(x, target, mask)
    jax.block_until_ready(loss)

    # Pure-JAX reference check of the PyTorch semantics.
    ref = jnp.mean((x * mask - target) ** 2)
    assert jnp.allclose(loss, ref, rtol=1e-5, atol=1e-6), (loss, ref)

    # Also exercise the ragged-tile (in-kernel masking) path at a small,
    # non-128-aligned size.
    shape2 = (1, 3, 7, 5)
    k1, k2, k3 = jax.random.split(jax.random.PRNGKey(0), 3)
    x2 = jax.random.normal(k1, shape2, dtype=jnp.float32)
    t2 = jax.random.normal(k2, shape2, dtype=jnp.float32)
    m2 = jax.random.uniform(k3, shape2) > 0.5           # bool
    loss2 = masked_mse_loss(x2, t2, m2)
    jax.block_until_ready(loss2)
    ref2 = jnp.mean((x2 * m2 - t2) ** 2)
    assert jnp.allclose(loss2, ref2, rtol=1e-5, atol=1e-6), (loss2, ref2)

    print("KERNEL_OK")
</pallas_src>

<mosaic_0001>
module attributes {stable_mosaic.version = 11 : i64} {
  func.func @_masked_mse_sum_kernel(%arg0: i32, %arg1: i32, %arg2: memref<32x128xf32, #tpu.memory_space<vmem>>, %arg3: memref<32x128xf32, #tpu.memory_space<vmem>>, %arg4: memref<32x128xi32, #tpu.memory_space<vmem>>, %arg5: memref<1x1xf32, #tpu.memory_space<smem>>, %arg6: memref<8x128xf32, #tpu.memory_space<vmem>>) attributes {dimension_semantics = [#tpu.dimension_semantics<parallel>, #tpu.dimension_semantics<arbitrary>], iteration_bounds = array<i64: 1, 1>, scalar_prefetch = 0 : i64, scratch_operands = 1 : i64, tpu.core_type = #tpu.core_type<tc>, window_params = [{transform_indices = @transform_0, window_bounds = array<i64: 32, 128>}, {transform_indices = @transform_1, window_bounds = array<i64: 32, 128>}, {transform_indices = @transform_2, window_bounds = array<i64: 32, 128>}, {transform_indices = @transform_3, window_bounds = array<i64: 1, 1>}]} {
    %c0_i32 = arith.constant 0 : i32
    %0 = arith.cmpi eq, %arg1, %c0_i32 : i32
    %1 = arith.extui %0 : i1 to i32
    %c0_i32_0 = arith.constant 0 : i32
    %2 = arith.cmpi ne, %1, %c0_i32_0 : i32
    scf.if %2 {
      %cst_12 = arith.constant 0.000000e+00 : f32
      %23 = vector.broadcast %cst_12 : f32 to vector<8x128xf32>
      %c0_13 = arith.constant 0 : index
      %c0_14 = arith.constant 0 : index
      %24 = vector.load %arg6[%c0_13, %c0_14] : memref<8x128xf32, #tpu.memory_space<vmem>>, vector<8x128xf32>
      tpu.vector_store %arg6[%c0_13, %c0_14], %23 {strides = array<i32>} : memref<8x128xf32, #tpu.memory_space<vmem>>, vector<8x128xf32>,
    } else {
    }
    %c0 = arith.constant 0 : index
    %c0_1 = arith.constant 0 : index
    %3 = vector.load %arg2[%c0, %c0_1] : memref<32x128xf32, #tpu.memory_space<vmem>>, vector<32x128xf32>
    %c0_2 = arith.constant 0 : index
    %c0_3 = arith.constant 0 : index
    %4 = vector.load %arg3[%c0_2, %c0_3] : memref<32x128xf32, #tpu.memory_space<vmem>>, vector<32x128xf32>
    %c0_4 = arith.constant 0 : index
    %c0_5 = arith.constant 0 : index
    %5 = vector.load %arg4[%c0_4, %c0_5] : memref<32x128xi32, #tpu.memory_space<vmem>>, vector<32x128xi32>
    %cst = arith.constant dense<0> : vector<32x128xi32>
    %6 = arith.cmpi ne, %5, %cst : vector<32x128xi32>
    %7 = arith.extui %6 : vector<32x128xi1> to vector<32x128xi32>
    %8 = arith.sitofp %7 : vector<32x128xi32> to vector<32x128xf32>
    %9 = arith.mulf %3, %8 : vector<32x128xf32>
    %10 = arith.subf %9, %4 : vector<32x128xf32>
    %11 = arith.mulf %10, %10 : vector<32x128xf32>
    %c1_i32 = arith.constant 1 : i32
    %12 = arith.muli %arg0, %c1_i32 : i32
    %13 = arith.addi %12, %arg1 : i32
    %c0_i32_6 = arith.constant 0 : i32
    %14 = arith.cmpi slt, %13, %c0_i32_6 : i32
    %15 = arith.extui %14 : i1 to i32
    %c0_i32_7 = arith.constant 0 : i32
    %16 = arith.cmpi ne, %15, %c0_i32_7 : i32
    scf.if %16 {
      %c0_12 = arith.constant 0 : index
      %c0_13 = arith.constant 0 : index
      %23 = vector.load %arg6[%c0_12, %c0_13] : memref<8x128xf32, #tpu.memory_space<vmem>>, vector<8x128xf32>
      %24 = vector.shape_cast %11 : vector<32x128xf32> to vector<4x8x128xf32>
      %cst_14 = arith.constant dense<0.000000e+00> : vector<8x128xf32>
      %25 = vector.multi_reduction <add>, %24, %cst_14 [0] : vector<4x8x128xf32> to vector<8x128xf32>
      %26 = arith.addf %23, %25 : vector<8x128xf32>
      %c0_15 = arith.constant 0 : index
      %c0_16 = arith.constant 0 : index
      %27 = vector.load %arg6[%c0_15, %c0_16] : memref<8x128xf32, #tpu.memory_space<vmem>>, vector<8x128xf32>
      tpu.vector_store %arg6[%c0_15, %c0_16], %26 {strides = array<i32>} : memref<8x128xf32, #tpu.memory_space<vmem>>, vector<8x128xf32>,
    } else {
    }
    %c0_i32_8 = arith.constant 0 : i32
    %17 = arith.cmpi sge, %13, %c0_i32_8 : i32
    %18 = arith.extui %17 : i1 to i32
    %c0_i32_9 = arith.constant 0 : i32
    %19 = arith.cmpi ne, %18, %c0_i32_9 : i32
    scf.if %19 {
      %c32_i32 = arith.constant 32 : i32
      %23 = arith.muli %13, %c32_i32 : i32
      %24 = tpu.iota {dimensions = array<i32: 0>} : vector<32x128xi32>
      %25 = vector.broadcast %23 : i32 to vector<32x128xi32>
      %26 = arith.addi %25, %24 : vector<32x128xi32>
      %c16_i32 = arith.constant 16 : i32
      %27 = vector.broadcast %c16_i32 : i32 to vector<32x128xi32>
      %28 = arith.cmpi slt, %26, %27 : vector<32x128xi32>
      %cst_12 = arith.constant 0.000000e+00 : f32
      %29 = vector.broadcast %cst_12 : f32 to vector<32x128xf32>
      %30 = arith.select %28, %11, %29 : vector<32x128xi1>, vector<32x128xf32>
      %c0_13 = arith.constant 0 : index
      %c0_14 = arith.constant 0 : index
      %31 = vector.load %arg6[%c0_13, %c0_14] : memref<8x128xf32, #tpu.memory_space<vmem>>, vector<8x128xf32>
      %32 = vector.shape_cast %30 : vector<32x128xf32> to vector<4x8x128xf32>
      %cst_15 = arith.constant dense<0.000000e+00> : vector<8x128xf32>
      %33 = vector.multi_reduction <add>, %32, %cst_15 [0] : vector<4x8x128xf32> to vector<8x128xf32>
      %34 = arith.addf %31, %33 : vector<8x128xf32>
      %c0_16 = arith.constant 0 : index
      %c0_17 = arith.constant 0 : index
      %35 = vector.load %arg6[%c0_16, %c0_17] : memref<8x128xf32, #tpu.memory_space<vmem>>, vector<8x128xf32>
      tpu.vector_store %arg6[%c0_16, %c0_17], %34 {strides = array<i32>} : memref<8x128xf32, #tpu.memory_space<vmem>>, vector<8x128xf32>,
    } else {
    }
    %c0_i32_10 = arith.constant 0 : i32
    %20 = arith.cmpi eq, %arg1, %c0_i32_10 : i32
    %21 = arith.extui %20 : i1 to i32
    %c0_i32_11 = arith.constant 0 : i32
    %22 = arith.cmpi ne, %21, %c0_i32_11 : i32
    scf.if %22 {
      %c0_12 = arith.constant 0 : index
      %c0_13 = arith.constant 0 : index
      %23 = vector.load %arg6[%c0_12, %c0_13] : memref<8x128xf32, #tpu.memory_space<vmem>>, vector<8x128xf32>
      %24 = vector.shape_cast %23 : vector<8x128xf32> to vector<1x8x128xf32>
      %cst_14 = arith.constant dense<0.000000e+00> : vector<1xf32>
      %25 = vector.multi_reduction <add>, %24, %cst_14 [1, 2] : vector<1x8x128xf32> to vector<1xf32>
      %26 = vector.shape_cast %25 : vector<1xf32> to vector<1x1x1xf32>
      %27 = vector.extract %26[0, 0, 0] : f32 from vector<1x1x1xf32>
      %c0_15 = arith.constant 0 : index
      %c0_16 = arith.constant 0 : index
      %28 = memref.load %arg5[%c0_15, %c0_16] : memref<1x1xf32, #tpu.memory_space<smem>>
      memref.store %27, %arg5[%c0_15, %c0_16] : memref<1x1xf32, #tpu.memory_space<smem>>
    } else {
    }
    return
  }
  func.func @transform_0(%arg0: i32, %arg1: i32) -> (i32, i32) {
    %c1_i32 = arith.constant 1 : i32
    %0 = arith.muli %arg0, %c1_i32 : i32
    %1 = arith.addi %0, %arg1 : i32
    %c0_i32 = arith.constant 0 : i32
    %c0_i32_0 = arith.constant 0 : i32
    return %1, %c0_i32 : i32, i32
  }
  func.func @transform_1(%arg0: i32, %arg1: i32) -> (i32, i32) {
    %c1_i32 = arith.constant 1 : i32
    %0 = arith.muli %arg0, %c1_i32 : i32
    %1 = arith.addi %0, %arg1 : i32
    %c0_i32 = arith.constant 0 : i32
    %c0_i32_0 = arith.constant 0 : i32
    return %1, %c0_i32 : i32, i32
  }
  func.func @transform_2(%arg0: i32, %arg1: i32) -> (i32, i32) {
    %c1_i32 = arith.constant 1 : i32
    %0 = arith.muli %arg0, %c1_i32 : i32
    %1 = arith.addi %0, %arg1 : i32
    %c0_i32 = arith.constant 0 : i32
    %c0_i32_0 = arith.constant 0 : i32
    return %1, %c0_i32 : i32, i32
  }
  func.func @transform_3(%arg0: i32, %arg1: i32) -> (i32, i32) {
    %c0_i32 = arith.constant 0 : i32
    %c0_i32_0 = arith.constant 0 : i32
    return %arg0, %c0_i32 : i32, i32
  }
}

</mosaic_0001>

<bundles_post_ra>
// kernel: tpu_custom_call.1
= control target key start
LH: loop header
LB: loop body
LE: loop exit
PB: predicated region body
PF: predicated region fallthrough
CT: control target
= control target key end

     0   :  { %8 = vsyncpa [#allocation4], 0  ;;  %s313_s0 = inlined_call_operand.vmem [shape: f32[16,128], index: 0, kind: input, shape index: {}]   ;;  %s314_s1 = inlined_call_operand.hbm [shape: f32[16,128], index: 1, kind: input, shape index: {}]   ;;  %s315_s2 = inlined_call_operand.vmem [shape: s32[16,128], index: 2, kind: input, shape index: {}]   ;;  %s316_s3 = inlined_call_operand.hbm [shape: f32[1,1], index: 3, kind: output, shape index: {}]  }
   0x1   :  { %9 = vsyncpa [#allocation5], 0 }
   0x2   :  { %32 = vsyncadd [#allocation4], 256  ;;  %s270_s12 = smov [#allocation3]  }
   0x3   :  { %s37_s13 = sshll.u32 %s270_s12, 4  ;;  %s38_s13 = int_to_ptr.vmem [resolvable:$true] %s37_s13 }
   0x4   :  { %s246_s14 = scalar_lea.vmem %s38_s13, 256  ;;  %s250_s15 = scalar_lea.vmem %s38_s13, 512 }
   0x5   :  { %p247_p0 = scmp.ne.s32.totalorder %s38_s13, %s246_s14  ;;  %p251_p1 = scmp.lt.s32.totalorder %s38_s13, %s38_s13 }
   0x6   :  { %p252_p2 = scmp.lt.s32.totalorder %s250_s15, %s246_s14 }
   0x8   :  { %p253_p3 = por %p252_p2, %p251_p1 }
   0xa   :  { %p254_p4 = pnand %p253_p3, %p247_p0 }
   0xc   :  { %257 = shalt.err (!%p254_p4)
}
   0xd   :  { %s271_s16 = smov 128   ;;  %s272_s17 = smov 8  }
   0xe   :  { %43 = dma.hbm_to_vmem [thread:$0]  %s314_s1, 256, %s38_s13, [#allocation4], %s271_s16, %s271_s16, %s272_s17  }
   0xf   :  { %266 = dma.done.wait [#allocation4], 512  }
  0x10   :  { %267 = vsyncadd [#allocation4], 4294966784  ;;  %v110_v0 = vld [vmem:[%s313_s0] sm:$0xff]  ;;  %v111_v1 = vld [vmem:[%s313_s0 + $0x8] sm:$0xff]  ;;  %v273_v6 = vmov 0.0   ;;  %s274_s1 = smov [#allocation6]  }
  0x11   :  { %v118_v2 = vld [vmem:[%s315_s2] sm:$0xff]  ;;  %v119_v3 = vld [vmem:[%s315_s2 + $0x8] sm:$0xff] }
  0x12   :  { %vm122_vm0 = vcmp.ne.s32.totalorder %v118_v2, 0  ;;  %vm123_vm1 = vcmp.ne.s32.totalorder %v119_v3, 0  ;;  %v114_v4 = vld [vmem:[#allocation3] sm:$0xff]  ;;  %v115_v5 = vld [vmem:[#allocation3 + $0x8] sm:$0xff] }
  0x13   :  { %v227_v7 = vsel %vm122_vm0, 1.0, %v273_v6  ;;  %v228_v8 = vsel %vm123_vm1, 1.0, %v273_v6 }
  0x14   :  { %v134_v9 = vmul.f32 %v227_v7, %v110_v0  ;;  %v135_v10 = vmul.f32 %v228_v8, %v111_v1 }
  0x16   :  { %v138_v11 = vsub.f32 %v134_v9, %v114_v4  ;;  %v139_v12 = vsub.f32 %v135_v10, %v115_v5 }
  0x18   :  { %v142_v13 = vmul.f32 %v138_v11, %v138_v11  ;;  %v143_v14 = vmul.f32 %v139_v12, %v139_v12 }
  0x1a   :  { %v181_v15 = vadd.f32 %v143_v14, %v142_v13 }
  0x1c   :  { %190 = vadd.xlane.f32.xlu0 %v181_v15 }
  0xa5   :  { %v191_v16 = vpop.xlane.xlu0 %190 }
  0xa6   :  { %v192_v17 = vrot.slane %v191_v16, 4 }
  0xa8   :  { %v193_v18 = vadd.f32 %v192_v17, %v191_v16 }
  0xaa   :  { %v194_v19 = vrot.slane %v193_v18, 2 }
  0xac   :  { %v195_v20 = vadd.f32 %v194_v19, %v193_v18 }
  0xae   :  { %v196_v21 = vrot.slane %v195_v20, 1 }
  0xb0   :  { %v197_v22 = vadd.f32 %v196_v21, %v195_v20 }
  0xb2   :  { %231 = vpush %v197_v22 }
  0xe3   :  { %s232_s0 = spop %231 }
  0xe4   :  { %200 = sst [smem:[#allocation6]] %s232_s0 }
  0xe5   :  { %208 = dma.smem_to_hbm %s274_s1, 16, %s316_s3, [#allocation5]  }
  0xe6   :  { %268 = dma.done.wait [#allocation5], 16  }
  0xe7   :  { %269 = vsyncadd [#allocation5], 4294967280 }
  0xe8   :  { %212 = sfence }
  0xe9   :  { %213 = vsyncpa [#allocation4], 1 }
  0xea   :  { %214 = vsyncpa [#allocation5], 1 }

</bundles_post_ra>
